<compile_context>
chip_gen: v6e
topology: v6e:2x2x1
jax: 0.10.0
libtpu: 0.0.40
codegen_flags: <defaults>
</compile_context>

<pallas_src>
import functools

import jax
import jax.numpy as jnp
from jax.experimental import pallas as pl
from jax.experimental.pallas import tpu as pltpu


def _roll(x, shift, axis):
    """Roll a 2-D f32 tile; XLU rotate when natively (8,128)-tiled, else jnp.roll."""
    h, w = x.shape
    if h % 8 == 0 and w % 128 == 0:
        return pltpu.roll(x, shift=shift, axis=axis)
    return jnp.roll(x, shift, axis=axis)


def _edge_kernel(x_ref, prev_ref, next_ref, o_ref, *, inv_scale, tile_h, halo, full_h):
    # x_ref: (C, TH, W)   prev_ref/next_ref: (C, HALO, W)   o_ref: (TH, W)
    C, th, W = x_ref.shape
    h = pl.program_id(1)
    n_h = pl.num_programs(1)
    has_prev = h > 0           # a row exists above this tile
    has_next = h < n_h - 1     # a row exists below this tile

    # Loop-invariant index planes (hoisted out of the channel loop).
    row = jax.lax.broadcasted_iota(jnp.int32, (th, W), 0)
    col = jax.lax.broadcasted_iota(jnp.int32, (th, W), 1)

    def channel_body(c, carry):
        dx, dy, d_prev, d_last = carry
        xc = x_ref[c].astype(jnp.float32)
        # Unmasked circular forward diffs; the wrapped last row / last column
        # are patched once after the loop (saves ~2 cmp + 2 select per elem
        # per channel -- the VALU slot is the binding unit on v7x).
        dx = dx + jnp.abs(_roll(xc, th - 1, 0) - xc)
        dy = dy + jnp.abs(_roll(xc, W - 1, 1) - xc)
        # True forward diff of the tile's last row (uses the next-halo row).
        nxt = next_ref[c][0:1, :].astype(jnp.float32)
        d_last = d_last + jnp.abs(nxt - xc[th - 1:th, :])
        # Diff of the tile's first row against the prev-halo last row.
        prv = prev_ref[c][halo - 1:halo, :].astype(jnp.float32)
        d_prev = d_prev + jnp.abs(xc[0:1, :] - prv)
        return dx, dy, d_prev, d_last

    init = (
        jnp.zeros((th, W), jnp.float32),
        jnp.zeros((th, W), jnp.float32),
        jnp.zeros((1, W), jnp.float32),
        jnp.zeros((1, W), jnp.float32),
    )
    if C <= 4:
        carry = init
        for c in range(C):          # small C: fully unrolled
            carry = channel_body(c, carry)
        dx, dy, d_prev, d_last = carry
    else:                           # large C: bounded live ranges / compile time
        dx, dy, d_prev, d_last = jax.lax.fori_loop(0, C, channel_body, init, unroll=2)

    # One-time boundary patches (instead of per-channel masking).
    dx = jnp.where(row == th - 1, jnp.where(has_next, d_last, 0.0), dx)
    dy = jnp.where(col == W - 1, 0.0, dy)

    # gX[t] = dx[t] + dx[t-1]; halve globally-interior rows.
    d_prev = jnp.where(has_prev, d_prev, 0.0)
    dx_up = jnp.where(row == 0, d_prev, _roll(dx, 1, 0))
    g_x = dx + dx_up
    grow = row + h * tile_h
    g_x = jnp.where((grow > 0) & (grow < full_h - 1), g_x * 0.5, g_x)

    # gY[w] = dy[w] + dy[w-1]; halve interior columns.
    dy_left = jnp.where(col == 0, 0.0, _roll(dy, 1, 1))
    g_y = dy + dy_left
    g_y = jnp.where((col > 0) & (col < W - 1), g_y * 0.5, g_y)

    edge = g_x + g_y
    if inv_scale != 1.0:
        # Linear in scale -> fold 1/scale into one final multiply.
        edge = edge * jnp.float32(inv_scale)
    o_ref[...] = edge.astype(o_ref.dtype)


def _vmem_capacity_bytes():
    """Generation-aware VMEM capacity (falls back to the smallest: v7x 64 MiB)."""
    try:
        cap = int(getattr(pltpu.get_tpu_info(), "vmem_capacity_bytes", 0))
        if cap > 0:
            return cap
    except Exception:
        pass
    return 64 << 20


def _choose_tile_h(H, W, C, itemsize, out_itemsize, N, sub, vmem_cap):
    """Largest tile height (divisor of H, multiple of `sub`, <=512) whose
    double-buffered block + f32-temporary footprint fits ~45% of VMEM."""
    if H < sub or H % sub != 0:
        return H
    divs = [d for d in range(sub, H + 1, sub) if H % d == 0]

    def footprint(d):
        in_b = C * d * W * itemsize          # main input block
        halo_b = C * sub * W * itemsize      # one halo block
        out_b = d * W * out_itemsize         # output block
        tmp_b = 12 * d * W * 4               # in-kernel f32 temporaries
        return 2 * (in_b + 2 * halo_b + out_b) + tmp_b

    budget = int(0.45 * vmem_cap)
    good = [d for d in divs if d <= 512 and footprint(d) <= budget]
    if not good:
        return divs[0]
    if N == 1:
        # Keep >= 2 H-tiles so both v7x TensorCores have work on unbatched input;
        # for N >= 2 the batch axis already feeds both cores -> take the max TH.
        multi = [d for d in good if d < H]
        if multi:
            return max(multi)
    return max(good)


@functools.partial(jax.jit, static_argnames=("scale", "tile_h"))
def edge_map(img, scale=1, tile_h=None):
    """Pallas implementation of EdgeMap.forward. img: (N, C, H, W)."""
    N, C, H, W = img.shape
    floating = jnp.issubdtype(img.dtype, jnp.floating)
    out_dtype = img.dtype if floating else jnp.float32
    itemsize = jnp.dtype(img.dtype).itemsize
    out_itemsize = jnp.dtype(out_dtype).itemsize

    # dtype-aware sublane granularity: 8 (f32) / 16 (bf16) / 32 (int8/fp8).
    sub = max(8, 32 // itemsize)
    cap = _vmem_capacity_bytes()

    th = (_choose_tile_h(H, W, C, itemsize, out_itemsize, N, sub, cap)
          if tile_h is None else int(tile_h))
    if H % th != 0 or (th % sub != 0 and th != H):
        th = H                        # fall back to a single whole-H tile
    n_h = H // th

    # Halo slab delivering the single boundary row, sized to the dtype min tile.
    halo = sub if (H >= sub and H % sub == 0) else H
    r = th // halo                    # main-tile index -> halo-block index
    nblk = H // halo                  # number of halo blocks along H

    kernel = functools.partial(
        _edge_kernel, inv_scale=float(1.0 / scale), tile_h=th, halo=halo, full_h=H
    )

    main_spec = pl.BlockSpec((pl.Squeezed(), C, th, W), lambda n, h: (n, 0, h, 0))
    prev_spec = pl.BlockSpec(
        (pl.Squeezed(), C, halo, W),
        lambda n, h: (n, 0, jnp.maximum(h * r - 1, 0), 0),
    )
    next_spec = pl.BlockSpec(
        (pl.Squeezed(), C, halo, W),
        lambda n, h: (n, 0, jnp.minimum((h + 1) * r, nblk - 1), 0),
    )
    out_spec = pl.BlockSpec(
        (pl.Squeezed(), pl.Squeezed(), th, W), lambda n, h: (n, 0, h, 0)
    )

    # Explicit VMEM budget from the actual (double-buffered) block footprint,
    # capped generation-aware (never request all of v7x's 64 MiB).
    in_b = C * th * W * itemsize
    halo_b = C * halo * W * itemsize
    out_b = th * W * out_itemsize
    need = 2 * (in_b + 2 * halo_b + out_b) + 12 * th * W * 4 + (4 << 20)
    vmem_limit = min(max(need, 32 << 20), int(0.8 * cap))
    vmem_limit = int(max(vmem_limit, min(need, cap)))

    # TODO(synk): for very large C (deep feature maps) fold C into the grid as
    # an innermost "arbitrary" axis with VMEM-scratch accumulators.
    return pl.pallas_call(
        kernel,
        out_shape=jax.ShapeDtypeStruct((N, 1, H, W), out_dtype),
        grid=(N, n_h),
        in_specs=[main_spec, prev_spec, next_spec],
        out_specs=out_spec,
        compiler_params=pltpu.CompilerParams(
            dimension_semantics=("parallel", "parallel"),
            vmem_limit_bytes=vmem_limit,
        ),
    )(img, img, img)


def _edge_map_ref(img, scale=1):
    """Pure-JAX reference mirroring the PyTorch semantics exactly."""
    img = img / scale
    N, C, H, W = img.shape
    gradx = jnp.abs(img[..., 1:, :] - img[..., :-1, :]).sum(axis=1, keepdims=True)
    grady = jnp.abs(img[..., 1:] - img[..., :-1]).sum(axis=1, keepdims=True)
    gradX = jnp.zeros((N, 1, H, W), img.dtype)
    gradY = jnp.zeros((N, 1, H, W), img.dtype)
    gradX = gradX.at[..., :-1, :].add(gradx)
    gradX = gradX.at[..., 1:, :].add(gradx)
    gradX = gradX.at[..., 1:-1, :].divide(2)
    gradY = gradY.at[..., :-1].add(grady)
    gradY = gradY.at[..., 1:].add(grady)
    gradY = gradY.at[..., 1:-1].divide(2)
    return gradX + gradY


if __name__ == "__main__":
    # EdgeMap has no learnable parameters.
    key = jax.random.PRNGKey(0)
    k1, k2, k3, k4 = jax.random.split(key, 4)

    # Spec-sized input: batch=2, channels=4, 16x16.
    x = jax.random.uniform(k1, (2, 4, 16, 16), dtype=jnp.float32)
    out = jax.block_until_ready(edge_map(x, scale=1))
    ref = _edge_map_ref(x, scale=1)
    assert out.shape == (2, 1, 16, 16), out.shape
    assert jnp.allclose(out, ref, atol=1e-5, rtol=1e-5), float(
        jnp.max(jnp.abs(out - ref))
    )

    # Lane-aligned W (=128) + forced H-tiling + non-unit scale: exercises the
    # pltpu.roll (XLU) fast path, the halo BlockSpecs and the folded 1/scale.
    y = jax.random.uniform(k2, (2, 3, 32, 128), dtype=jnp.float32)
    out2 = jax.block_until_ready(edge_map(y, scale=2, tile_h=16))
    ref2 = _edge_map_ref(y, scale=2)
    assert out2.shape == (2, 1, 32, 128), out2.shape
    assert jnp.allclose(out2, ref2, atol=1e-5, rtol=1e-5), float(
        jnp.max(jnp.abs(out2 - ref2))
    )

    # C > 4 exercises the fori_loop channel reduction; N == 1 exercises the
    # multi-H-tile preference (auto TH=8 -> two tiles + halo path).
    z = jax.random.uniform(k3, (1, 6, 16, 128), dtype=jnp.float32)
    out3 = jax.block_until_ready(edge_map(z, scale=1))
    ref3 = _edge_map_ref(z, scale=1)
    assert out3.shape == (1, 1, 16, 128), out3.shape
    assert jnp.allclose(out3, ref3, atol=1e-5, rtol=1e-5), float(
        jnp.max(jnp.abs(out3 - ref3))
    )

    # bf16 input: dtype-aware 16-row halo / tile granularity.
    wb = jax.random.uniform(k4, (1, 3, 32, 128), dtype=jnp.float32).astype(jnp.bfloat16)
    out4 = jax.block_until_ready(edge_map(wb, scale=1))
    ref4 = _edge_map_ref(wb.astype(jnp.float32), scale=1).astype(jnp.bfloat16)
    assert out4.shape == (1, 1, 32, 128) and out4.dtype == jnp.bfloat16
    assert jnp.allclose(
        out4.astype(jnp.float32), ref4.astype(jnp.float32), atol=5e-2
    ), float(jnp.max(jnp.abs(out4.astype(jnp.float32) - ref4.astype(jnp.float32))))

    print("KERNEL_OK")
</pallas_src>

<mosaic_0001>
module attributes {stable_mosaic.version = 11 : i64} {
  func.func @_edge_kernel(%arg0: i32, %arg1: i32, %arg2: memref<1x4x16x16xf32, #tpu.memory_space<vmem>>, %arg3: memref<1x4x8x16xf32, #tpu.memory_space<vmem>>, %arg4: memref<1x4x8x16xf32, #tpu.memory_space<vmem>>, %arg5: memref<1x1x16x16xf32, #tpu.memory_space<vmem>>) attributes {dimension_semantics = [#tpu.dimension_semantics<parallel>, #tpu.dimension_semantics<parallel>], iteration_bounds = array<i64: 2, 1>, scalar_prefetch = 0 : i64, scratch_operands = 0 : i64, tpu.core_type = #tpu.core_type<tc>, window_params = [{transform_indices = @transform_0, window_bounds = array<i64: 1, 4, 16, 16>}, {transform_indices = @transform_1, window_bounds = array<i64: 1, 4, 8, 16>}, {transform_indices = @transform_2, window_bounds = array<i64: 1, 4, 8, 16>}, {transform_indices = @transform_3, window_bounds = array<i64: 1, 1, 16, 16>}]} {
    %c0_i32 = arith.constant 0 : i32
    %0 = arith.cmpi sgt, %arg1, %c0_i32 : i32
    %c0_i32_0 = arith.constant 0 : i32
    %1 = arith.cmpi slt, %arg1, %c0_i32_0 : i32
    %2 = tpu.iota {dimensions = array<i32: 0>} : vector<16x16xi32>
    %3 = tpu.iota {dimensions = array<i32: 1>} : vector<16x16xi32>
    %cst = arith.constant 0.000000e+00 : f32
    %4 = vector.broadcast %cst : f32 to vector<16x16xf32>
    %cst_1 = arith.constant 0.000000e+00 : f32
    %5 = vector.broadcast %cst_1 : f32 to vector<16x16xf32>
    %cst_2 = arith.constant 0.000000e+00 : f32
    %6 = vector.broadcast %cst_2 : f32 to vector<1x16xf32>
    %cst_3 = arith.constant 0.000000e+00 : f32
    %7 = vector.broadcast %cst_3 : f32 to vector<1x16xf32>
    %c0 = arith.constant 0 : index
    %c0_4 = arith.constant 0 : index
    %c0_5 = arith.constant 0 : index
    %c0_6 = arith.constant 0 : index
    %8 = vector.load %arg2[%c0, %c0_4, %c0_5, %c0_6] : memref<1x4x16x16xf32, #tpu.memory_space<vmem>>, vector<1x1x16x16xf32>
    %9 = vector.shape_cast %8 : vector<1x1x16x16xf32> to vector<16x16xf32>
    %10 = vector.extract_strided_slice %9 {offsets = [1, 0], sizes = [15, 16], strides = [1, 1]} : vector<16x16xf32> to vector<15x16xf32>
    %11 = vector.extract_strided_slice %9 {offsets = [0, 0], sizes = [1, 16], strides = [1, 1]} : vector<16x16xf32> to vector<1x16xf32>
    %12 = tpu.concatenate %10, %11 in 0 : vector<15x16xf32>, vector<1x16xf32> -> vector<16x16xf32>
    %13 = arith.subf %12, %9 : vector<16x16xf32>
    %14 = math.absf %13 : vector<16x16xf32>
    %15 = arith.addf %4, %14 : vector<16x16xf32>
    %16 = vector.extract_strided_slice %9 {offsets = [0, 1], sizes = [16, 15], strides = [1, 1]} : vector<16x16xf32> to vector<16x15xf32>
    %17 = vector.extract_strided_slice %9 {offsets = [0, 0], sizes = [16, 1], strides = [1, 1]} : vector<16x16xf32> to vector<16x1xf32>
    %18 = tpu.concatenate %16, %17 in 1 : vector<16x15xf32>, vector<16x1xf32> -> vector<16x16xf32>
    %19 = arith.subf %18, %9 : vector<16x16xf32>
    %20 = math.absf %19 : vector<16x16xf32>
    %21 = arith.addf %5, %20 : vector<16x16xf32>
    %c0_7 = arith.constant 0 : index
    %c0_8 = arith.constant 0 : index
    %c0_9 = arith.constant 0 : index
    %c0_10 = arith.constant 0 : index
    %22 = vector.load %arg4[%c0_7, %c0_8, %c0_9, %c0_10] : memref<1x4x8x16xf32, #tpu.memory_space<vmem>>, vector<1x1x8x16xf32>
    %23 = vector.shape_cast %22 : vector<1x1x8x16xf32> to vector<8x16xf32>
    %24 = vector.extract_strided_slice %23 {offsets = [0, 0], sizes = [1, 16], strides = [1, 1]} : vector<8x16xf32> to vector<1x16xf32>
    %25 = vector.extract_strided_slice %9 {offsets = [15, 0], sizes = [1, 16], strides = [1, 1]} : vector<16x16xf32> to vector<1x16xf32>
    %26 = arith.subf %24, %25 : vector<1x16xf32>
    %27 = math.absf %26 : vector<1x16xf32>
    %28 = arith.addf %7, %27 : vector<1x16xf32>
    %c0_11 = arith.constant 0 : index
    %c0_12 = arith.constant 0 : index
    %c0_13 = arith.constant 0 : index
    %c0_14 = arith.constant 0 : index
    %29 = vector.load %arg3[%c0_11, %c0_12, %c0_13, %c0_14] : memref<1x4x8x16xf32, #tpu.memory_space<vmem>>, vector<1x1x8x16xf32>
    %30 = vector.shape_cast %29 : vector<1x1x8x16xf32> to vector<8x16xf32>
    %31 = vector.extract_strided_slice %30 {offsets = [7, 0], sizes = [1, 16], strides = [1, 1]} : vector<8x16xf32> to vector<1x16xf32>
    %32 = vector.extract_strided_slice %9 {offsets = [0, 0], sizes = [1, 16], strides = [1, 1]} : vector<16x16xf32> to vector<1x16xf32>
    %33 = arith.subf %32, %31 : vector<1x16xf32>
    %34 = math.absf %33 : vector<1x16xf32>
    %35 = arith.addf %6, %34 : vector<1x16xf32>
    %c0_15 = arith.constant 0 : index
    %c1 = arith.constant 1 : index
    %c0_16 = arith.constant 0 : index
    %c0_17 = arith.constant 0 : index
    %36 = vector.load %arg2[%c0_15, %c1, %c0_16, %c0_17] : memref<1x4x16x16xf32, #tpu.memory_space<vmem>>, vector<1x1x16x16xf32>
    %37 = vector.shape_cast %36 : vector<1x1x16x16xf32> to vector<16x16xf32>
    %38 = vector.extract_strided_slice %37 {offsets = [1, 0], sizes = [15, 16], strides = [1, 1]} : vector<16x16xf32> to vector<15x16xf32>
    %39 = vector.extract_strided_slice %37 {offsets = [0, 0], sizes = [1, 16], strides = [1, 1]} : vector<16x16xf32> to vector<1x16xf32>
    %40 = tpu.concatenate %38, %39 in 0 : vector<15x16xf32>, vector<1x16xf32> -> vector<16x16xf32>
    %41 = arith.subf %40, %37 : vector<16x16xf32>
    %42 = math.absf %41 : vector<16x16xf32>
    %43 = arith.addf %15, %42 : vector<16x16xf32>
    %44 = vector.extract_strided_slice %37 {offsets = [0, 1], sizes = [16, 15], strides = [1, 1]} : vector<16x16xf32> to vector<16x15xf32>
    %45 = vector.extract_strided_slice %37 {offsets = [0, 0], sizes = [16, 1], strides = [1, 1]} : vector<16x16xf32> to vector<16x1xf32>
    %46 = tpu.concatenate %44, %45 in 1 : vector<16x15xf32>, vector<16x1xf32> -> vector<16x16xf32>
    %47 = arith.subf %46, %37 : vector<16x16xf32>
    %48 = math.absf %47 : vector<16x16xf32>
    %49 = arith.addf %21, %48 : vector<16x16xf32>
    %c0_18 = arith.constant 0 : index
    %c1_19 = arith.constant 1 : index
    %c0_20 = arith.constant 0 : index
    %c0_21 = arith.constant 0 : index
    %50 = vector.load %arg4[%c0_18, %c1_19, %c0_20, %c0_21] : memref<1x4x8x16xf32, #tpu.memory_space<vmem>>, vector<1x1x8x16xf32>
    %51 = vector.shape_cast %50 : vector<1x1x8x16xf32> to vector<8x16xf32>
    %52 = vector.extract_strided_slice %51 {offsets = [0, 0], sizes = [1, 16], strides = [1, 1]} : vector<8x16xf32> to vector<1x16xf32>
    %53 = vector.extract_strided_slice %37 {offsets = [15, 0], sizes = [1, 16], strides = [1, 1]} : vector<16x16xf32> to vector<1x16xf32>
    %54 = arith.subf %52, %53 : vector<1x16xf32>
    %55 = math.absf %54 : vector<1x16xf32>
    %56 = arith.addf %28, %55 : vector<1x16xf32>
    %c0_22 = arith.constant 0 : index
    %c1_23 = arith.constant 1 : index
    %c0_24 = arith.constant 0 : index
    %c0_25 = arith.constant 0 : index
    %57 = vector.load %arg3[%c0_22, %c1_23, %c0_24, %c0_25] : memref<1x4x8x16xf32, #tpu.memory_space<vmem>>, vector<1x1x8x16xf32>
    %58 = vector.shape_cast %57 : vector<1x1x8x16xf32> to vector<8x16xf32>
    %59 = vector.extract_strided_slice %58 {offsets = [7, 0], sizes = [1, 16], strides = [1, 1]} : vector<8x16xf32> to vector<1x16xf32>
    %60 = vector.extract_strided_slice %37 {offsets = [0, 0], sizes = [1, 16], strides = [1, 1]} : vector<16x16xf32> to vector<1x16xf32>
    %61 = arith.subf %60, %59 : vector<1x16xf32>
    %62 = math.absf %61 : vector<1x16xf32>
    %63 = arith.addf %35, %62 : vector<1x16xf32>
    %c0_26 = arith.constant 0 : index
    %c2 = arith.constant 2 : index
    %c0_27 = arith.constant 0 : index
    %c0_28 = arith.constant 0 : index
    %64 = vector.load %arg2[%c0_26, %c2, %c0_27, %c0_28] : memref<1x4x16x16xf32, #tpu.memory_space<vmem>>, vector<1x1x16x16xf32>
    %65 = vector.shape_cast %64 : vector<1x1x16x16xf32> to vector<16x16xf32>
    %66 = vector.extract_strided_slice %65 {offsets = [1, 0], sizes = [15, 16], strides = [1, 1]} : vector<16x16xf32> to vector<15x16xf32>
    %67 = vector.extract_strided_slice %65 {offsets = [0, 0], sizes = [1, 16], strides = [1, 1]} : vector<16x16xf32> to vector<1x16xf32>
    %68 = tpu.concatenate %66, %67 in 0 : vector<15x16xf32>, vector<1x16xf32> -> vector<16x16xf32>
    %69 = arith.subf %68, %65 : vector<16x16xf32>
    %70 = math.absf %69 : vector<16x16xf32>
    %71 = arith.addf %43, %70 : vector<16x16xf32>
    %72 = vector.extract_strided_slice %65 {offsets = [0, 1], sizes = [16, 15], strides = [1, 1]} : vector<16x16xf32> to vector<16x15xf32>
    %73 = vector.extract_strided_slice %65 {offsets = [0, 0], sizes = [16, 1], strides = [1, 1]} : vector<16x16xf32> to vector<16x1xf32>
    %74 = tpu.concatenate %72, %73 in 1 : vector<16x15xf32>, vector<16x1xf32> -> vector<16x16xf32>
    %75 = arith.subf %74, %65 : vector<16x16xf32>
    %76 = math.absf %75 : vector<16x16xf32>
    %77 = arith.addf %49, %76 : vector<16x16xf32>
    %c0_29 = arith.constant 0 : index
    %c2_30 = arith.constant 2 : index
    %c0_31 = arith.constant 0 : index
    %c0_32 = arith.constant 0 : index
    %78 = vector.load %arg4[%c0_29, %c2_30, %c0_31, %c0_32] : memref<1x4x8x16xf32, #tpu.memory_space<vmem>>, vector<1x1x8x16xf32>
    %79 = vector.shape_cast %78 : vector<1x1x8x16xf32> to vector<8x16xf32>
    %80 = vector.extract_strided_slice %79 {offsets = [0, 0], sizes = [1, 16], strides = [1, 1]} : vector<8x16xf32> to vector<1x16xf32>
    %81 = vector.extract_strided_slice %65 {offsets = [15, 0], sizes = [1, 16], strides = [1, 1]} : vector<16x16xf32> to vector<1x16xf32>
    %82 = arith.subf %80, %81 : vector<1x16xf32>
    %83 = math.absf %82 : vector<1x16xf32>
    %84 = arith.addf %56, %83 : vector<1x16xf32>
    %c0_33 = arith.constant 0 : index
    %c2_34 = arith.constant 2 : index
    %c0_35 = arith.constant 0 : index
    %c0_36 = arith.constant 0 : index
    %85 = vector.load %arg3[%c0_33, %c2_34, %c0_35, %c0_36] : memref<1x4x8x16xf32, #tpu.memory_space<vmem>>, vector<1x1x8x16xf32>
    %86 = vector.shape_cast %85 : vector<1x1x8x16xf32> to vector<8x16xf32>
    %87 = vector.extract_strided_slice %86 {offsets = [7, 0], sizes = [1, 16], strides = [1, 1]} : vector<8x16xf32> to vector<1x16xf32>
    %88 = vector.extract_strided_slice %65 {offsets = [0, 0], sizes = [1, 16], strides = [1, 1]} : vector<16x16xf32> to vector<1x16xf32>
    %89 = arith.subf %88, %87 : vector<1x16xf32>
    %90 = math.absf %89 : vector<1x16xf32>
    %91 = arith.addf %63, %90 : vector<1x16xf32>
    %c0_37 = arith.constant 0 : index
    %c3 = arith.constant 3 : index
    %c0_38 = arith.constant 0 : index
    %c0_39 = arith.constant 0 : index
    %92 = vector.load %arg2[%c0_37, %c3, %c0_38, %c0_39] : memref<1x4x16x16xf32, #tpu.memory_space<vmem>>, vector<1x1x16x16xf32>
    %93 = vector.shape_cast %92 : vector<1x1x16x16xf32> to vector<16x16xf32>
    %94 = vector.extract_strided_slice %93 {offsets = [1, 0], sizes = [15, 16], strides = [1, 1]} : vector<16x16xf32> to vector<15x16xf32>
    %95 = vector.extract_strided_slice %93 {offsets = [0, 0], sizes = [1, 16], strides = [1, 1]} : vector<16x16xf32> to vector<1x16xf32>
    %96 = tpu.concatenate %94, %95 in 0 : vector<15x16xf32>, vector<1x16xf32> -> vector<16x16xf32>
    %97 = arith.subf %96, %93 : vector<16x16xf32>
    %98 = math.absf %97 : vector<16x16xf32>
    %99 = arith.addf %71, %98 : vector<16x16xf32>
    %100 = vector.extract_strided_slice %93 {offsets = [0, 1], sizes = [16, 15], strides = [1, 1]} : vector<16x16xf32> to vector<16x15xf32>
    %101 = vector.extract_strided_slice %93 {offsets = [0, 0], sizes = [16, 1], strides = [1, 1]} : vector<16x16xf32> to vector<16x1xf32>
    %102 = tpu.concatenate %100, %101 in 1 : vector<16x15xf32>, vector<16x1xf32> -> vector<16x16xf32>
    %103 = arith.subf %102, %93 : vector<16x16xf32>
    %104 = math.absf %103 : vector<16x16xf32>
    %105 = arith.addf %77, %104 : vector<16x16xf32>
    %c0_40 = arith.constant 0 : index
    %c3_41 = arith.constant 3 : index
    %c0_42 = arith.constant 0 : index
    %c0_43 = arith.constant 0 : index
    %106 = vector.load %arg4[%c0_40, %c3_41, %c0_42, %c0_43] : memref<1x4x8x16xf32, #tpu.memory_space<vmem>>, vector<1x1x8x16xf32>
    %107 = vector.shape_cast %106 : vector<1x1x8x16xf32> to vector<8x16xf32>
    %108 = vector.extract_strided_slice %107 {offsets = [0, 0], sizes = [1, 16], strides = [1, 1]} : vector<8x16xf32> to vector<1x16xf32>
    %109 = vector.extract_strided_slice %93 {offsets = [15, 0], sizes = [1, 16], strides = [1, 1]} : vector<16x16xf32> to vector<1x16xf32>
    %110 = arith.subf %108, %109 : vector<1x16xf32>
    %111 = math.absf %110 : vector<1x16xf32>
    %112 = arith.addf %84, %111 : vector<1x16xf32>
    %c0_44 = arith.constant 0 : index
    %c3_45 = arith.constant 3 : index
    %c0_46 = arith.constant 0 : index
    %c0_47 = arith.constant 0 : index
    %113 = vector.load %arg3[%c0_44, %c3_45, %c0_46, %c0_47] : memref<1x4x8x16xf32, #tpu.memory_space<vmem>>, vector<1x1x8x16xf32>
    %114 = vector.shape_cast %113 : vector<1x1x8x16xf32> to vector<8x16xf32>
    %115 = vector.extract_strided_slice %114 {offsets = [7, 0], sizes = [1, 16], strides = [1, 1]} : vector<8x16xf32> to vector<1x16xf32>
    %116 = vector.extract_strided_slice %93 {offsets = [0, 0], sizes = [1, 16], strides = [1, 1]} : vector<16x16xf32> to vector<1x16xf32>
    %117 = arith.subf %116, %115 : vector<1x16xf32>
    %118 = math.absf %117 : vector<1x16xf32>
    %119 = arith.addf %91, %118 : vector<1x16xf32>
    %c15_i32 = arith.constant 15 : i32
    %120 = vector.broadcast %c15_i32 : i32 to vector<16x16xi32>
    %121 = arith.cmpi eq, %2, %120 : vector<16x16xi32>
    %cst_48 = arith.constant 0.000000e+00 : f32
    %122 = vector.broadcast %cst_48 : f32 to vector<1x16xf32>
    %123 = arith.select %1, %112, %122 : vector<1x16xf32>
    %124 = vector.shape_cast %123 : vector<1x16xf32> to vector<1x16xf32>
    %125 = vector.broadcast %124 : vector<1x16xf32> to vector<16x16xf32>
    %126 = arith.select %121, %125, %99 : vector<16x16xi1>, vector<16x16xf32>
    %c15_i32_49 = arith.constant 15 : i32
    %127 = vector.broadcast %c15_i32_49 : i32 to vector<16x16xi32>
    %128 = arith.cmpi eq, %3, %127 : vector<16x16xi32>
    %cst_50 = arith.constant 0.000000e+00 : f32
    %129 = vector.broadcast %cst_50 : f32 to vector<16x16xf32>
    %130 = arith.select %128, %129, %105 : vector<16x16xi1>, vector<16x16xf32>
    %cst_51 = arith.constant 0.000000e+00 : f32
    %131 = vector.broadcast %cst_51 : f32 to vector<1x16xf32>
    %132 = arith.select %0, %119, %131 : vector<1x16xf32>
    %c0_i32_52 = arith.constant 0 : i32
    %133 = vector.broadcast %c0_i32_52 : i32 to vector<16x16xi32>
    %134 = arith.cmpi eq, %2, %133 : vector<16x16xi32>
    %135 = vector.extract_strided_slice %126 {offsets = [15, 0], sizes = [1, 16], strides = [1, 1]} : vector<16x16xf32> to vector<1x16xf32>
    %136 = vector.extract_strided_slice %126 {offsets = [0, 0], sizes = [15, 16], strides = [1, 1]} : vector<16x16xf32> to vector<15x16xf32>
    %137 = tpu.concatenate %135, %136 in 0 : vector<1x16xf32>, vector<15x16xf32> -> vector<16x16xf32>
    %138 = vector.shape_cast %132 : vector<1x16xf32> to vector<1x16xf32>
    %139 = vector.broadcast %138 : vector<1x16xf32> to vector<16x16xf32>
    %140 = arith.select %134, %139, %137 : vector<16x16xi1>, vector<16x16xf32>
    %141 = arith.addf %126, %140 : vector<16x16xf32>
    %c16_i32 = arith.constant 16 : i32
    %142 = arith.muli %arg1, %c16_i32 : i32
    %143 = vector.broadcast %142 : i32 to vector<16x16xi32>
    %144 = arith.addi %2, %143 : vector<16x16xi32>
    %c0_i32_53 = arith.constant 0 : i32
    %145 = vector.broadcast %c0_i32_53 : i32 to vector<16x16xi32>
    %146 = arith.cmpi sgt, %144, %145 : vector<16x16xi32>
    %c15_i32_54 = arith.constant 15 : i32
    %147 = vector.broadcast %c15_i32_54 : i32 to vector<16x16xi32>
    %148 = arith.cmpi slt, %144, %147 : vector<16x16xi32>
    %149 = arith.andi %146, %148 : vector<16x16xi1>
    %cst_55 = arith.constant 5.000000e-01 : f32
    %150 = vector.broadcast %cst_55 : f32 to vector<16x16xf32>
    %151 = arith.mulf %141, %150 : vector<16x16xf32>
    %152 = arith.select %149, %151, %141 : vector<16x16xi1>, vector<16x16xf32>
    %c0_i32_56 = arith.constant 0 : i32
    %153 = vector.broadcast %c0_i32_56 : i32 to vector<16x16xi32>
    %154 = arith.cmpi eq, %3, %153 : vector<16x16xi32>
    %155 = vector.extract_strided_slice %130 {offsets = [0, 15], sizes = [16, 1], strides = [1, 1]} : vector<16x16xf32> to vector<16x1xf32>
    %156 = vector.extract_strided_slice %130 {offsets = [0, 0], sizes = [16, 15], strides = [1, 1]} : vector<16x16xf32> to vector<16x15xf32>
    %157 = tpu.concatenate %155, %156 in 1 : vector<16x1xf32>, vector<16x15xf32> -> vector<16x16xf32>
    %cst_57 = arith.constant 0.000000e+00 : f32
    %158 = vector.broadcast %cst_57 : f32 to vector<16x16xf32>
    %159 = arith.select %154, %158, %157 : vector<16x16xi1>, vector<16x16xf32>
    %160 = arith.addf %130, %159 : vector<16x16xf32>
    %c0_i32_58 = arith.constant 0 : i32
    %161 = vector.broadcast %c0_i32_58 : i32 to vector<16x16xi32>
    %162 = arith.cmpi sgt, %3, %161 : vector<16x16xi32>
    %c15_i32_59 = arith.constant 15 : i32
    %163 = vector.broadcast %c15_i32_59 : i32 to vector<16x16xi32>
    %164 = arith.cmpi slt, %3, %163 : vector<16x16xi32>
    %165 = arith.andi %162, %164 : vector<16x16xi1>
    %cst_60 = arith.constant 5.000000e-01 : f32
    %166 = vector.broadcast %cst_60 : f32 to vector<16x16xf32>
    %167 = arith.mulf %160, %166 : vector<16x16xf32>
    %168 = arith.select %165, %167, %160 : vector<16x16xi1>, vector<16x16xf32>
    %169 = arith.addf %152, %168 : vector<16x16xf32>
    %c0_61 = arith.constant 0 : index
    %c0_62 = arith.constant 0 : index
    %c0_63 = arith.constant 0 : index
    %c0_64 = arith.constant 0 : index
    %170 = vector.load %arg5[%c0_61, %c0_62, %c0_63, %c0_64] : memref<1x1x16x16xf32, #tpu.memory_space<vmem>>, vector<1x1x16x16xf32>
    %171 = vector.shape_cast %170 : vector<1x1x16x16xf32> to vector<16x16xf32>
    %172 = vector.shape_cast %169 : vector<16x16xf32> to vector<1x1x16x16xf32>
    tpu.vector_store %arg5[%c0_61, %c0_62, %c0_63, %c0_64], %172 {strides = array<i32>} : memref<1x1x16x16xf32, #tpu.memory_space<vmem>>, vector<1x1x16x16xf32>,
    return
  }
  func.func @transform_0(%arg0: i32, %arg1: i32) -> (i32, i32, i32, i32) {
    %c0_i32 = arith.constant 0 : i32
    %c0_i32_0 = arith.constant 0 : i32
    %c0_i32_1 = arith.constant 0 : i32
    return %arg0, %c0_i32, %arg1, %c0_i32_0 : i32, i32, i32, i32
  }
  func.func @transform_1(%arg0: i32, %arg1: i32) -> (i32, i32, i32, i32) {
    %c2_i32 = arith.constant 2 : i32
    %0 = arith.muli %arg1, %c2_i32 : i32
    %c1_i32 = arith.constant 1 : i32
    %1 = arith.subi %0, %c1_i32 : i32
    %c0_i32 = arith.constant 0 : i32
    %2 = arith.maxsi %1, %c0_i32 : i32
    %c0_i32_0 = arith.constant 0 : i32
    %c0_i32_1 = arith.constant 0 : i32
    %c0_i32_2 = arith.constant 0 : i32
    return %arg0, %c0_i32_0, %2, %c0_i32_1 : i32, i32, i32, i32
  }
  func.func @transform_2(%arg0: i32, %arg1: i32) -> (i32, i32, i32, i32) {
    %c1_i32 = arith.constant 1 : i32
    %0 = arith.addi %arg1, %c1_i32 : i32
    %c2_i32 = arith.constant 2 : i32
    %1 = arith.muli %0, %c2_i32 : i32
    %c1_i32_0 = arith.constant 1 : i32
    %2 = arith.minsi %1, %c1_i32_0 : i32
    %c0_i32 = arith.constant 0 : i32
    %c0_i32_1 = arith.constant 0 : i32
    %c0_i32_2 = arith.constant 0 : i32
    return %arg0, %c0_i32, %2, %c0_i32_1 : i32, i32, i32, i32
  }
  func.func @transform_3(%arg0: i32, %arg1: i32) -> (i32, i32, i32, i32) {
    %c0_i32 = arith.constant 0 : i32
    %c0_i32_0 = arith.constant 0 : i32
    %c0_i32_1 = arith.constant 0 : i32
    return %arg0, %c0_i32, %arg1, %c0_i32_0 : i32, i32, i32, i32
  }
}

</mosaic_0001>

<bundles_post_ra>
// kernel: edge_map.1
= control target key start
LH: loop header
LB: loop body
LE: loop exit
PB: predicated region body
PF: predicated region fallthrough
CT: control target
= control target key end

     0   :  { %s1406_s0 = inlined_call_operand.hbm [shape: f32[2,4,16,16], index: 0, kind: input, shape index: {}, may-alias: {0,1,2}]   ;;  %s1407_s1 = inlined_call_operand.hbm [shape: f32[2,4,16,16], index: 1, kind: input, shape index: {}, may-alias: {0,1,2}]   ;;  %s1408_s2 = inlined_call_operand.hbm [shape: f32[2,4,16,16], index: 2, kind: input, shape index: {}, may-alias: {0,1,2}]   ;;  %s1409_s3 = inlined_call_operand.hbm [shape: f32[2,1,16,16], index: 3, kind: output, shape index: {}]  }
   0x1   :  { %1418 = sst [smem:[#allocation16_spill]] %s1407_s1 }
   0x2   :  { %8 = vsyncpa [#allocation3], 0 }
   0x3   :  { %10 = vsyncpa [#allocation3 + $0x1], 0 }
   0x4   :  { %11 = vsyncpa [#allocation6], 0 }
   0x5   :  { %13 = vsyncpa [#allocation6 + $0x1], 0 }
   0x6   :  { %14 = vsyncpa [#allocation4], 0 }
   0x7   :  { %16 = vsyncpa [#allocation4 + $0x1], 0  ;;  %s1106_s12 = smov 0   ;;  %s1108_s13 = smov 0  }
   0x8   :  { %s1110_s14 = smov 0   ;;  %s1112_s15 = smov 0  }
   0x9   :  { %s1114_s16 = smov 0   ;;  %s1116_s17 = smov 0  }
   0xa LB: > { %1419 = sst [smem:[#allocation12_spill]] %s1058_s14  ;;  %s1137_s18 = sadd.s32 4294967295, %s1070_s17   ;;  %s1070_s17 = sphi %s1116_s17, %s22_s17   ;;  %s1066_s16 = sphi %s1114_s16, %s1437_s16   ;;  %s1062_s15 = sphi %s1112_s15, %s1436_s15   ;;  %s1058_s14 = sphi %s1110_s14, %s1435_s14   ;;  %s1054_s13 = sphi %s1108_s13, %s1439_s13   ;;  %s1050_s12 = sphi %s1106_s12, %s1438_s12  }
   0xb   : > { %1420 = sst [smem:[#allocation13_spill]] %s1066_s16  ;;  %s780_s19 = sadd.s32 4294967294, %s1070_s17  }
   0xc   : > { %s34_s20 = sadd.s32 1, %s1066_s16  ;;  %s43_s21 = sadd.s32 1, %s1058_s14 }
   0xd   : > { %p36_p0 = scmp.ge.s32.totalorder %s34_s20, 2  ;;  %p50_p1 = scmp.ne.s32.totalorder %s1058_s14, %s1054_s13 }
   0xe   : > { %p51_p2 = scmp.eq.s32.totalorder %s1070_s17, 0  ;;  %p56_p3 = scmp.ne.s32.totalorder %s1054_s13, %s1050_s12 }
   0xf   : > { %s1441_s20 = smov (%p36_p0, %s34_s20), 0  ;;  %p57_p5 = scmp.eq.s32.totalorder %s1137_s18, 0 }
  0x10   : > { %1421 = sst [smem:[#allocation14_spill]] %s1441_s20  ;;  %p1149_p4 = por %p51_p2, %p50_p1 }
  0x11   : > { %s38_s23 = ssub.s32 %s1066_s16, %s1441_s20  ;;  %p154_p6 = scmp.eq.s32.totalorder %s1137_s18, 1 }
  0x12   : > { %p41_p7 = scmp.eq.s32.totalorder %s38_s23, 0  ;;  %p1157_p8 = por %p57_p5, %p56_p3 }
  0x13   : > { %p1161_p9 = por %p154_p6, %p50_p1  ;;  %p160_p10 = scmp.eq.s32.totalorder %s780_s19, 1 }
  0x14   : > { %s1166_s26 = scalar_select %p41_p7, %s1058_s14, %s43_s21  }
  0x15   : > { %p1168_p11 = por %p160_p10, %p56_p3  ;;  %p842_p13 = scmp.lt.s32.totalorder %s1070_s17, 2 }
  0x16   : > { %1425 = sst [smem:[#allocation15_spill]] %s1166_s26  ;;  %s1175_s28 = sand.u32 1, %s1058_s14  }
  0x17   : > { %s1178_s29 = sshll.u32 %s1066_s16, 10  ;;  %p1182_p0 = pnand %p842_p13, %p1149_p4 }
  0x18   : > { %s203_s4 = sand.u32 1, %s1070_s17   ;;  %s786_s5 = sshll.u32 %s1175_s28, 5 }
  0x19   : > { %s1428_s1 = sld [smem:[#allocation16_spill]]  ;;  %s207_s9 = scalar_lea.vmem [#allocation5], %s786_s5 }
  0x1a   : > { %s219_s10 = sshll.u32 %s207_s9, 4  ;;  %s1192_s11 = scalar_lea.sflag [#allocation6], %s203_s4  ;;  %s220_s10 = int_to_ptr.vmem [resolvable:$true] %s219_s10 }
  0x1b   : > { %p904_p1 = pneg %p1182_p0  ;;  %s915_s19 = scalar_lea.vmem %s220_s10, 512 }
  0x1c   : > { %p916_p2 = scmp.ne.s32.totalorder %s220_s10, %s915_s19  ;;  %s1072_s21 = smov [#allocation5]  }
  0x1d   : > { %s920_s22 = sshll.u32 %s1072_s21, 4  ;;  %s921_s22 = int_to_ptr.vmem [resolvable:$false] %s920_s22 }
  0x1e   : > { %p918_p3 = pnand %p916_p2, %p904_p1  ;;  %s922_s23 = scalar_lea.vmem %s921_s22, 1024 }
  0x1f   : > { %s218_s8 = scalar_lea.hbm %s1428_s1, %s1178_s29  ;;  %p923_p5 = scmp.lt.s32.totalorder %s220_s10, %s921_s22 }
  0x20   : > { %p919_p4 = pneg %p918_p3  ;;  %p924_p6 = scmp.lt.s32.totalorder %s922_s23, %s915_s19 }
  0x22   : > { %p925_p7 = por %p924_p6, %p923_p5 }
  0x24   : > { %p926_p10 = pnand %p925_p7, %p919_p4 }
  0x26   : > { %929 = shalt.err (!%p926_p10)
}
  0x27   : > { %s1413_s6 = smov 256   ;;  %s1414_s4 = smov 128  }
  0x28   : > { %s1416_s7 = smov 8   ;;  %s233_s9 = scalar_lea.vmem [#allocation7], %s786_s5 }
  0x29   : > { %834 = dma.hbm_to_vmem [thread:$0]  (!%p1182_p0), %s218_s8, 512, %s220_s10, %s1192_s11, %s1413_s6, %s1414_s4, %s1416_s7  }
  0x2a   : > { %s245_s19 = sshll.u32 %s233_s9, 4  ;;  %p792_p13 = scmp.ge.s32.totalorder %s1070_s17, 1  ;;  %s1206_s19 = int_to_ptr.vmem [resolvable:$true] %s245_s19 }
  0x2b   : > { %p253_p2 = scmp.lt.s32.totalorder %s1070_s17, 3  ;;  %s783_s22 = sshll.u32 %s1175_s28, 6 }
  0x2c   : > { %s192_s20 = scalar_lea.hbm %s1406_s0, %s1178_s29  ;;  %s817_s16 = sadd.s32 128, %s1178_s29 }
  0x2d   : > { %p1209_p3 = pnand %p792_p13, %p253_p2  ;;  %s184_s26 = scalar_lea.vmem [#allocation2], %s783_s22 }
  0x2e   : > { %s193_s14 = sshll.u32 %s184_s26, 4  ;;  %s1222_s10 = scalar_lea.hbm %s1408_s2, %s817_s16  ;;  %s194_s14 = int_to_ptr.vmem [resolvable:$true] %s193_s14 }
  0x2f   : > { %s181_s9 = scalar_lea.sflag [#allocation3], %s1175_s28  ;;  %s943_s6 = scalar_lea.vmem %s194_s14, 1024 }
  0x30   : > { %p944_p4 = scmp.ne.s32.totalorder %s194_s14, %s943_s6  ;;  %s1076_s4 = smov [#allocation2]  }
  0x31   : > { %s948_s7 = sshll.u32 %s1076_s4, 4  ;;  %s949_s7 = int_to_ptr.vmem [resolvable:$false] %s948_s7 }
  0x32   : > { %p946_p5 = pnand %p944_p4, %p904_p1  ;;  %s950_s1 = scalar_lea.vmem %s949_s7, 2048 }
  0x33   : > { %p951_p7 = scmp.lt.s32.totalorder %s194_s14, %s949_s7  ;;  %p952_p10 = scmp.lt.s32.totalorder %s950_s1, %s943_s6 }
  0x34   : > { %p947_p6 = pneg %p946_p5 }
  0x35   : > { %p953_p13 = por %p952_p10, %p951_p7 }
  0x37   : > { %p954_p2 = pnand %p953_p13, %p947_p6 }
  0x39   : > { %957 = shalt.err (!%p954_p2)
}
  0x3a   : > { %s1430_s16 = smov 8   ;;  %s1431_s26 = smov 128  }
  0x3b   : > { %831 = dma.hbm_to_vmem [thread:$0]  (!%p1182_p0), %s192_s20, 1024, %s194_s14, %s181_s9, %s1431_s26, %s1431_s26, %s1430_s16  }
  0x3c   : > { %s971_s28 = scalar_lea.vmem %s1206_s19, 512  ;;  %s1077_s29 = smov [#allocation7]  }
  0x3d   : > { %p972_p4 = scmp.ne.s32.totalorder %s1206_s19, %s971_s28  ;;  %s976_s6 = sshll.u32 %s1077_s29, 4  ;;  %s977_s6 = int_to_ptr.vmem [resolvable:$false] %s976_s6 }
  0x3e   : > { %s978_s4 = scalar_lea.vmem %s977_s6, 1024  ;;  %p979_p6 = scmp.lt.s32.totalorder %s1206_s19, %s977_s6 }
  0x3f   : > { %p974_p5 = pnand %p972_p4, %p904_p1  ;;  %p980_p7 = scmp.lt.s32.totalorder %s978_s4, %s971_s28 }
  0x41   : > { %p975_p12 = pneg %p974_p5  ;;  %p981_p10 = por %p980_p7, %p979_p6 }
  0x43   : > { %p982_p13 = pnand %p981_p10, %p975_p12 }
  0x45   : > { %985 = shalt.err (!%p982_p13)
}
  0x46   : > { %s1432_s14 = smov 256   ;;  %257 = sbr.rel (%p1209_p3) target bundleno = 373 (0x175), region = 32 }
  0x47   : > { %837 = dma.hbm_to_vmem [thread:$0]  (!%p1182_p0), %s1222_s10, 512, %s1206_s19, %s1192_s11, %s1432_s14, %s1431_s26, %s1430_s16  }
  0x48   : > { %s1250_s20 = sand.u32 (!%p1209_p3), 1, %s1054_s13  }
  0x49   : > { %s793_s7 = sshll.u32 (!%p1209_p3), %s1250_s20, 6  ;;  %s260_s22 = scalar_lea.sflag (!%p1209_p3), [#allocation3], %s1250_s20 }
  0x4a   : > { %s263_s23 = scalar_lea.vmem (!%p1209_p3), [#allocation2], %s793_s7 }
  0x4b   : > { %1037 = dma.done.wait (%p1157_p8), %s260_s22, 1024  }
  0x4c   : > { %1039 = vsyncadd (%p1157_p8), %s260_s22, 4294966272  ;;  %s268_s30 = sand.u32 1, %s1137_s18  }
  0x4d   : > { %s269_s11 = scalar_lea.sflag [#allocation6], %s268_s30 }
  0x4e   : > { %1041 = dma.done.wait (%p1157_p8), %s269_s11, 1024  }
  0x4f   : > { %1043 = vsyncadd (%p1157_p8), %s269_s11, 4294966272  ;;  %v1263_v0 = vld [vmem:[%s263_s23] sm:$0xff]  ;;  %s1078_s19 = smov 15   ;;  %s1079_s21 = smov 127   ;;  %v1267_v1 = vld [vmem:[%s263_s23 + $0x8] sm:$0xff]  ;;  %vm361_vm0 = vcmask 121856   ;;  %v326_v34 = vlaneseq }
  0x50   : > { %355 = vrot.lane.b32.xlu1 %v1263_v0, %s1078_s19  ;;  %349 = vrot.lane.b32.xlu0 %v1263_v0, %s1079_s21  ;;  %v1271_v2 = vld [vmem:[%s263_s23 + $0x18] sm:$0xff]  ;;  %v1273_v3 = vld [vmem:[%s263_s23 + $0x10] sm:$0xff]  ;;  %s1080_s18 = smov 113   ;;  %s1081_s24 = smov 1   ;;  %v336_v58 = vrot.slane %v1263_v0, 1  ;;  %v337_v59 = vrot.slane %v1267_v1, 1 }
  0x51   : > { %v1279_v4 = vld [vmem:[%s263_s23 + $0x28] sm:$0xff]  ;;  %v1281_v5 = vld [vmem:[%s263_s23 + $0x20] sm:$0xff]  ;;  %v1287_v6 = vld [vmem:[%s263_s23 + $0x38] sm:$0xff]  ;;  %v1309_v45 = vand.u32 127, %v326_v34  ;;  %v389_v60 = vrot.slane %v1271_v2, 1  ;;  %v388_v61 = vrot.slane %v1273_v3, 1 }
  0x52   : > { %v1289_v7 = vld [vmem:[%s263_s23 + $0x30] sm:$0xff]  ;;  %vm335_vm2 = vcmask 1046528   ;;  %vm567_vm4 = vcmask 1040384   ;;  %vm610_vm6 = vcmask 7168   ;;  %s796_s8 = sshll.u32 %s1250_s20, 4  ;;  %s818_s5 = sshll.u32 %s1062_s15, 8 }
  0x53   : > { %vm554_vm1 = vcmp.eq.s32.totalorder %v1309_v45, 15  ;;  %v342_v62 = vsel %vm335_vm2, %v337_v59, %v336_v58  ;;  %v394_v63 = vsel %vm335_vm2, %v389_v60, %v388_v61  ;;  %vm595_vm7 = vcmp.eq.s32.totalorder %v1309_v45, 0  ;;  %s313_s10 = scalar_lea.vmem [#allocation8], %s796_s8  ;;  %s1356_s26 = scalar_lea.hbm %s1409_s3, %s818_s5 }
  0x54   : > { %357 = vrot.lane.b32.xlu1 %v1267_v1, %s1078_s19  ;;  %351 = vrot.lane.b32.xlu0 %v1267_v1, %s1079_s21  ;;  %vm617_vm8 = vcmp.gt.s32.totalorder %v1309_v45, 0  ;;  %vm618_vm9 = vcmp.lt.s32.totalorder %v1309_v45, 15  ;;  %s645_s9 = sshll.u32 %s313_s10, 4  ;;  %vm626_vm13 = vcmask 130048   ;;  %s630_s15 = scalar_lea.sflag [#allocation4], %s1250_s20  ;;  %s1358_s9 = int_to_ptr.vmem [resolvable:$true] %s645_s9 }
  0x55   : > { %vm619_vm12 = vmand %vm617_vm8, %vm618_vm9  ;;  %s986_s28 = scalar_lea.vmem %s1358_s9, 256  ;;  %s1083_s29 = smov [#allocation8]  }
  0x56   : > { %p987_p8 = scmp.ne.s32.totalorder %s1358_s9, %s986_s28  ;;  %s990_s6 = sshll.u32 %s1083_s29, 4  ;;  %s991_s6 = int_to_ptr.vmem [resolvable:$false] %s990_s6 }
  0x57   : > { %s992_s4 = scalar_lea.vmem %s991_s6, 512  ;;  %p993_p1 = scmp.lt.s32.totalorder %s1358_s9, %s991_s6 }
  0x58   : > { %403 = vrot.lane.b32.xlu1 %v1271_v2, %s1079_s21  ;;  %401 = vrot.lane.b32.xlu0 %v1273_v3, %s1079_s21  ;;  %p988_p12 = pnand %p987_p8, %p1161_p9  ;;  %p994_p3 = scmp.lt.s32.totalorder %s992_s4, %s986_s28 }
  0x5a   : > { %p989_p0 = pneg %p988_p12  ;;  %p995_p2 = por %p994_p3, %p993_p1 }
  0x5c   : > { %409 = vrot.lane.b32.xlu1 %v1271_v2, %s1078_s19  ;;  %407 = vrot.lane.b32.xlu0 %v1273_v3, %s1078_s19  ;;  %p996_p4 = pnand %p995_p2, %p989_p0 }
  0x60   : > { %456 = vrot.lane.b32.xlu1 %v1279_v4, %s1079_s21  ;;  %454 = vrot.lane.b32.xlu0 %v1281_v5, %s1079_s21 }
  0x64   : > { %462 = vrot.lane.b32.xlu1 %v1279_v4, %s1078_s19  ;;  %460 = vrot.lane.b32.xlu0 %v1281_v5, %s1078_s19 }
  0x68   : > { %509 = vrot.lane.b32.xlu1 %v1287_v6, %s1079_s21  ;;  %507 = vrot.lane.b32.xlu0 %v1289_v7, %s1079_s21 }
  0x6c   : > { %515 = vrot.lane.b32.xlu1 %v1287_v6, %s1078_s19  ;;  %513 = vrot.lane.b32.xlu0 %v1289_v7, %s1078_s19 }
  0xc2   : > { %v356_v8 = vpop.permute.xlu1 %355  ;;  %v350_v9 = vpop.permute.xlu0 %349 }
  0xc3   : > { %v362_v20 = vsel %vm361_vm0, %v350_v9, %v356_v8  ;;  %v442_v8 = vrot.slane %v1279_v4, 1  ;;  %v441_v9 = vrot.slane %v1281_v5, 1 }
  0xc4   : > { %v364_v28 = vsub.f32 %v362_v20, %v1263_v0 }
  0xc6   : > { %v358_v10 = vpop.permute.xlu1 %357  ;;  %v352_v11 = vpop.permute.xlu0 %351  ;;  %v366_v37 = vand.u32 2147483647, %v364_v28  ;;  %v327_v28 = vshrl.u32 %v326_v34, 7 }
  0xc7   : > { %v363_v23 = vsel %vm361_vm0, %v352_v11, %v358_v10  ;;  %v338_v10 = vsel %vm335_vm2, %v336_v58, %v337_v59  ;;  %v344_v11 = vsub.f32 %v342_v62, %v1267_v1 }
  0xc8   : > { %v365_v29 = vsub.f32 %v363_v23, %v1267_v1  ;;  %vm561_vm5 = vcmp.eq.s32.totalorder %v327_v28, 0  ;;  %vm585_vm11 = vcmp.gt.s32.totalorder %v327_v28, 0 }
  0xca   : > { %v404_v12 = vpop.permute.xlu1 %403  ;;  %v402_v13 = vpop.permute.xlu0 %401  ;;  %v367_v38 = vand.u32 2147483647, %v365_v29 }
  0xce   : > { %v410_v14 = vpop.permute.xlu1 %409  ;;  %v408_v15 = vpop.permute.xlu0 %407 }
  0xcf   : > { %v414_v18 = vsel %vm361_vm0, %v404_v12, %v410_v14  ;;  %v413_v19 = vsel %vm361_vm0, %v402_v13, %v408_v15  ;;  %v390_v12 = vsel %vm335_vm2, %v388_v61, %v389_v60  ;;  %v396_v13 = vsub.f32 %v394_v63, %v1271_v2 }
  0xd0   : > { %v416_v26 = vsub.f32 %v414_v18, %v1271_v2  ;;  %v415_v27 = vsub.f32 %v413_v19, %v1273_v3  ;;  %v447_v14 = vsel %vm335_vm2, %v442_v8, %v441_v9  ;;  %v495_v15 = vrot.slane %v1287_v6, 1 }
  0xd1   : > { %v343_v18 = vsub.f32 %v338_v10, %v1263_v0  ;;  %v346_v19 = vand.u32 2147483647, %v344_v11  ;;  %v398_v20 = vand.u32 2147483647, %v396_v13  ;;  %v449_v1 = vsub.f32 %v447_v14, %v1279_v4 }
  0xd2   : > { %v457_v16 = vpop.permute.xlu1 %456  ;;  %v455_v17 = vpop.permute.xlu0 %454  ;;  %v418_v35 = vand.u32 2147483647, %v416_v26  ;;  %v417_v36 = vand.u32 2147483647, %v415_v27 }
  0xd3   : > { %v345_v2 = vand.u32 2147483647, %v343_v18  ;;  %v400_v26 = vadd.f32 %v398_v20, %v346_v19  ;;  %v451_v27 = vand.u32 2147483647, %v449_v1 }
  0xd4   : > { %v420_v46 = vadd.f32 %v418_v35, %v367_v38  ;;  %v419_v47 = vadd.f32 %v417_v36, %v366_v37  ;;  %v1082_v38 = vmov 0.0  }
  0xd6   : > { %v463_v21 = vpop.permute.xlu1 %462  ;;  %v461_v22 = vpop.permute.xlu0 %460 }
  0xd7   : > { %v467_v24 = vsel %vm361_vm0, %v457_v16, %v463_v21  ;;  %v466_v25 = vsel %vm361_vm0, %v455_v17, %v461_v22  ;;  %v494_v16 = vrot.slane %v1289_v7, 1  ;;  %v395_v17 = vsub.f32 %v390_v12, %v1273_v3 }
  0xd8   : > { %v469_v30 = vsub.f32 %v467_v24, %v1279_v4  ;;  %v468_v31 = vsub.f32 %v466_v25, %v1281_v5  ;;  %v443_v21 = vsel %vm335_vm2, %v441_v9, %v442_v8  ;;  %v550_v4 = vsub.s32 0, %v327_v28 }
  0xd9   : > { %v500_v22 = vsel %vm335_vm2, %v495_v15, %v494_v16  ;;  %v397_v23 = vand.u32 2147483647, %v395_v17  ;;  %v448_v24 = vsub.f32 %v443_v21, %v1281_v5  ;;  %v496_v25 = vsel %vm335_vm2, %v494_v16, %v495_v15 }
  0xda   : > { %v510_v32 = vpop.permute.xlu1 %509  ;;  %v508_v33 = vpop.permute.xlu0 %507  ;;  %v471_v39 = vand.u32 2147483647, %v469_v30  ;;  %v470_v40 = vand.u32 2147483647, %v468_v31  ;;  %v502_v3 = vsub.f32 %v500_v22, %v1287_v6  ;;  %v501_v30 = vsub.f32 %v496_v25, %v1289_v7 }
  0xdb   : > { %v399_v0 = vadd.f32 %v397_v23, %v345_v2  ;;  %v450_v29 = vand.u32 2147483647, %v448_v24  ;;  %v453_v31 = vadd.f32 %v451_v27, %v400_v26  ;;  %v551_v5 = vrot.slane %v1082_v38, %v550_v4 }
  0xdc   : > { %v473_v50 = vadd.f32 %v471_v39, %v420_v46  ;;  %v472_v51 = vadd.f32 %v470_v40, %v419_v47  ;;  %v503_v36 = vand.u32 2147483647, %v501_v30 }
  0xdd   : > { %v452_v35 = vadd.f32 %v450_v29, %v399_v0 }
  0xde   : > { %v516_v41 = vpop.permute.xlu1 %515  ;;  %v514_v42 = vpop.permute.xlu0 %513 }
  0xdf   : > { %v520_v43 = vsel %vm361_vm0, %v510_v32, %v516_v41  ;;  %v519_v44 = vsel %vm361_vm0, %v508_v33, %v514_v42  ;;  %v504_v32 = vand.u32 2147483647, %v502_v3  ;;  %v328_v33 = vadd.s32 8, %v327_v28 }
  0xe0   : > { %v522_v48 = vsub.f32 %v520_v43, %v1287_v6  ;;  %v521_v49 = vsub.f32 %v519_v44, %v1289_v7  ;;  %v505_v39 = vadd.f32 %v503_v36, %v452_v35 }
  0xe1   : > { %v506_v37 = vadd.f32 %v504_v32, %v453_v31  ;;  %vm543_vm3 = vcmp.eq.s32.totalorder %v328_v33, 15  ;;  %vm588_vm10 = vcmp.lt.s32.totalorder %v328_v33, 15 }
  0xe2   : > { %v524_v52 = vand.u32 2147483647, %v522_v48  ;;  %v523_v53 = vand.u32 2147483647, %v521_v49  ;;  %v568_v41 = vrot.slane %v505_v39, 7 }
  0xe3   : > { %v553_v40 = vsel %vm543_vm3, %v551_v5, %v506_v37 }
  0xe4   : > { %v526_v54 = vadd.f32 %v524_v52, %v473_v50  ;;  %v525_v55 = vadd.f32 %v523_v53, %v472_v51  ;;  %v564_v6 = vrot.slane %v553_v40, 7 }
  0xe6   : > { %v1314_v56 = vsel %vm554_vm1, 0.0, %v526_v54  ;;  %v1316_v57 = vsel %vm554_vm1, 0.0, %v525_v55  ;;  %v572_v34 = vsel %vm567_vm4, %v564_v6, %v568_v41  ;;  %v569_v42 = vsel %vm567_vm4, %v568_v41, %v564_v6 }
  0xe7   : > { %600 = vrot.lane.b32.xlu1 %v1314_v56, %s1080_s18  ;;  %598 = vrot.lane.b32.xlu0 %v1316_v57, %s1080_s18  ;;  %v577_v7 = vsel %vm561_vm5, %v551_v5, %v572_v34  ;;  %v580_v46 = vadd.f32 %v569_v42, %v553_v40 }
  0xe8   : > { %v579_v47 = vadd.f32 %v577_v7, %v505_v39 }
  0xe9   : > { %v592_v50 = vmul.f32 0.5, %v580_v46 }
  0xea   : > { %v591_v52 = vmul.f32 0.5, %v579_v47 }
  0xeb   : > { %606 = vrot.lane.b32.xlu1 %v1314_v56, %s1081_s24  ;;  %604 = vrot.lane.b32.xlu0 %v1316_v57, %s1081_s24  ;;  %v594_v45 = vsel %vm588_vm10, %v592_v50, %v580_v46 }
  0xec   : > { %v593_v61 = vsel %vm585_vm11, %v591_v52, %v579_v47 }
 0x159   : > { %v601_v43 = vpop.permute.xlu1 %600  ;;  %v599_v44 = vpop.permute.xlu0 %598 }
 0x15d   : > { %v607_v48 = vpop.permute.xlu1 %606  ;;  %v605_v49 = vpop.permute.xlu0 %604 }
 0x15e   : > { %v612_v51 = vsel %vm610_vm6, %v601_v43, %v607_v48  ;;  %v611_v53 = vsel %vm610_vm6, %v599_v44, %v605_v49 }
 0x15f   : > { %v614_v54 = vsel %vm595_vm7, 0.0, %v612_v51  ;;  %v613_v55 = vsel %vm595_vm7, 0.0, %v611_v53 }
 0x160   : > { %v616_v58 = vadd.f32 %v614_v54, %v1314_v56  ;;  %v615_v59 = vadd.f32 %v613_v55, %v1316_v57 }
 0x162   : > { %v621_v60 = vmul.f32 0.5, %v616_v58  ;;  %v620_v62 = vmul.f32 0.5, %v615_v59 }
 0x164   : > { %v623_v63 = vsel %vm619_vm12, %v621_v60, %v616_v58  ;;  %v622_v8 = vsel %vm619_vm12, %v620_v62, %v615_v59 }
 0x165   : > { %v625_v56 = vadd.f32 %v623_v63, %v594_v45  ;;  %v624_v57 = vadd.f32 %v622_v8, %v593_v61 }
 0x167   : > { %627 = vst.msk [vmem:[%s313_s10] sm:$0xff] %vm626_vm13, %v624_v57  ;;  %628 = vst.msk [vmem:[%s313_s10 + $0x8] sm:$0xff] %vm626_vm13, %v625_v56 }
 0x168   : > { %999 = shalt.err (!%p996_p4)
}
 0x169   : > { %s1000_s14 = scalar_lea.hbm %s1356_s26, 256  ;;  %s1004_s23 = scalar_lea.hbm %s1409_s3, 512 }
 0x16a   : > { %p1001_p5 = scmp.ne.s32.totalorder %s1356_s26, %s1000_s14  ;;  %p1005_p10 = scmp.lt.s32.totalorder %s1356_s26, %s1409_s3 }
 0x16b   : > { %p1006_p13 = scmp.lt.s32.totalorder %s1004_s23, %s1000_s14 }
 0x16c   : > { %p1002_p6 = pnand %p1001_p5, %p1161_p9 }
 0x16d   : > { %p1007_p8 = por %p1006_p13, %p1005_p10 }
 0x16e   : > { %p1003_p7 = pneg %p1002_p6 }
 0x170   : > { %p1008_p12 = pnand %p1007_p8, %p1003_p7 }
 0x172   : > { %1011 = shalt.err (!%p1008_p12)
}
 0x173   : > { %s1084_s19 = smov 128   ;;  %s1085_s21 = smov 8  }
 0x174   : > { %826 = dma.vmem_to_hbm [thread:$0]  (%p1161_p9), %s1358_s9, 256, %s1356_s26, %s630_s15, %s1084_s19, %s1084_s19, %s1085_s21  }
 0x175 PF: > { %s660_s18 = sand.u32 1, %s1050_s12   ;;  %p1433_p0 = scmp.ge.s32.totalorder %s1070_s17, 2 }
 0x176   : > { %s661_s24 = scalar_lea.sflag [#allocation4], %s660_s18 }
 0x177   : > { %p839_p1 = pnand %p1433_p0, %p1168_p11 }
 0x179   : > { %p840_p3 = pneg %p839_p1 }
 0x17b   : > { %1045 = dma.done.wait (%p840_p3), %s661_s24, 256  }
 0x17c   : > { %1047 = vsyncadd (%p840_p3), %s661_s24, 4294967040  ;;  %s22_s17 = sadd.s32 1, %s1070_s17   ;;  %s1434_s8 = sld [smem:[#allocation12_spill]] }
 0x17d   : > { %p19_p2 = scmp.ge.s32.totalorder %s22_s17, 4   ;;  %s1435_s14 = sld [smem:[#allocation15_spill]] }
 0x17e   : > { %s1436_s15 = sld [smem:[#allocation13_spill]]  ;;  %s1438_s12 = smov %s1054_s13 }
 0x17f   : > { %s1437_s16 = sld [smem:[#allocation14_spill]]  ;;  %21 = sbr.rel (!%p19_p2) target bundleno = 10 (0xa), region = 110 }
 0x182   : > { %s1439_s13 = smov %s1434_s8 }
 0x184   :  { %666 = vsyncpa [#allocation3], 1 }
 0x185   :  { %668 = vsyncpa [#allocation3 + $0x1], 1 }
 0x186   :  { %669 = vsyncpa [#allocation6], 1 }
 0x187   :  { %671 = vsyncpa [#allocation6 + $0x1], 1 }
 0x188   :  { %672 = vsyncpa [#allocation4], 1 }
 0x189   :  { %674 = vsyncpa [#allocation4 + $0x1], 1 }

</bundles_post_ra>
